<compile_context>
chip_gen: v7x
topology: tpu7x:2x2x1
jax: 0.10.0
libtpu: 0.0.40
codegen_flags: <defaults>
</compile_context>

<pallas_src>
import functools

import jax
import jax.numpy as jnp
from jax import lax
from jax.experimental import pallas as pl
from jax.experimental.pallas import tpu as pltpu


def _round_up(a, b):
    return (a + b - 1) // b * b


def _vmem_capacity_bytes():
    """Generation-aware VMEM capacity (64 MiB on v7x, 128 MiB on v5e/v6e)."""
    try:
        return int(pltpu.get_tpu_info().vmem_capacity_bytes)
    except Exception:
        return 64 * 1024 * 1024  # conservative fallback (v7x-sized)


def _pick_tm(ohw_full, cin, cout, khkw, halo, budget_bytes):
    """Largest lane tile (multiple of 128) that fits the VMEM budget."""
    # Per-lane streamed cost: x (2 specs x 2 buffers, bf16), out (2 buffers,
    # f32), f32 accumulator, transient bf16 window/slice temporaries.
    per_lane = 2 * 2 * cin * 2 + 2 * cout * 4 + cout * 4 + 3 * cin * 2
    # Resident weight/bias (budgeted double-buffered, as the pipeline allocates).
    fixed = 2 * khkw * cout * cin * 2 + 2 * cout * 4
    avail = max(budget_bytes - fixed, 128 * per_lane)
    tm = (avail // per_lane) // 128 * 128
    tm_min = _round_up(max(halo, 1), 128)          # halo must fit inside one tile
    tm_cap = max(_round_up(ohw_full, 128), tm_min)  # no point exceeding the output
    return max(min(tm, tm_cap), tm_min)


def _conv_block_kernel(xa_ref, xb_ref, w_ref, b_ref, o_ref, *,
                       shifts, halo, negative_slope):
    # xa_ref: (1, Cin, TM)   bf16  current flattened-spatial tile
    # xb_ref: (1, Cin, TM)   bf16  next tile (only first `halo` cols are used)
    # w_ref : (KH*KW, Cout, Cin) bf16   resident
    # b_ref : (Cout, 1) f32              resident
    # o_ref : (1, Cout, TM) f32
    cout, tm = o_ref.shape[1], o_ref.shape[2]

    xa = xa_ref[0]                                   # (Cin, TM)
    if halo > 0:
        xwin = jnp.concatenate([xa, xb_ref[0, :, :halo]], axis=1)  # (Cin, TM+halo)
    else:
        xwin = xa

    acc = jnp.zeros((cout, tm), jnp.float32)
    for idx, s in enumerate(shifts):                 # static unrolled KH*KW loop
        xs = xwin[:, s:s + tm]                       # static shifted window (Cin, TM)
        acc = acc + jnp.dot(w_ref[idx], xs, preferred_element_type=jnp.float32)

    acc = acc + b_ref[...]                           # bias broadcast over lanes (f32)
    o_ref[0] = jnp.where(acc >= 0.0, acc, negative_slope * acc).astype(o_ref.dtype)


def conv_block_forward(x, weight, bias, *, stride=1, padding=0, negative_slope=0.2):
    """ConvBlock forward: Conv2d(+bias) + LeakyReLU(negative_slope).

    x:      (N, Cin, H, W)       float32, NCHW (PyTorch layout)
    weight: (Cout, Cin, KH, KW)  float32 (PyTorch Conv2d layout)
    bias:   (Cout,)              float32
    returns (N, Cout, OH, OW)    float32, NCHW
    """
    N, Cin, H, W = x.shape
    Cout, wcin, KH, KW = weight.shape
    assert wcin == Cin
    if stride != 1:
        # TODO(synk): implement strided variant (flat-shift trick needs stride=1).
        raise NotImplementedError("Pallas ConvBlock kernel supports stride=1 only.")

    if padding > 0:
        x = jnp.pad(x, ((0, 0), (0, 0), (padding, padding), (padding, padding)))
        H, W = H + 2 * padding, W + 2 * padding

    OH = H - KH + 1
    OW = W - KW + 1
    assert OH > 0 and OW > 0
    OHW_full = OH * W                       # full-W flat output; cols >= OW dropped later
    halo = (KH - 1) * W + (KW - 1)          # largest flat shift of any kernel tap

    vmem_cap = _vmem_capacity_bytes()
    TM = _pick_tm(OHW_full, Cin, Cout, KH * KW, halo, (3 * vmem_cap) // 8)
    m_tiles = pl.cdiv(OHW_full, TM)
    HWp = (m_tiles + 1) * TM                # the halo block (m+1) always exists

    # Flatten + cast (single streaming pass over the 1x activation, no expansion).
    x_flat = x.reshape(N, Cin, H * W).astype(jnp.bfloat16)
    if HWp > H * W:
        x_flat = jnp.pad(x_flat, ((0, 0), (0, 0), (0, HWp - H * W)))

    # Weight per tap: w_r[kh*KW + kw] == weight[:, :, kh, kw] as (Cout, Cin).
    w_r = jnp.transpose(weight, (2, 3, 0, 1)).reshape(KH * KW, Cout, Cin)
    w_r = w_r.astype(jnp.bfloat16)
    b_r = bias.reshape(Cout, 1).astype(jnp.float32)
    shifts = tuple(kh * W + kw for kh in range(KH) for kw in range(KW))

    cost = pl.CostEstimate(
        flops=2 * N * OHW_full * Cin * KH * KW * Cout,
        transcendentals=0,
        bytes_accessed=(2 * x_flat.size * 2          # x read by tile + halo specs
                        + w_r.size * 2 + b_r.size * 4
                        + N * Cout * OHW_full * 4),
    )

    out_full = pl.pallas_call(
        functools.partial(_conv_block_kernel, shifts=shifts, halo=halo,
                          negative_slope=negative_slope),
        out_shape=jax.ShapeDtypeStruct((N, Cout, OHW_full), jnp.float32),
        grid_spec=pltpu.PrefetchScalarGridSpec(
            num_scalar_prefetch=0,
            grid=(N, m_tiles),
            in_specs=[
                pl.BlockSpec((1, Cin, TM), lambda n, m: (n, 0, m)),        # tile
                pl.BlockSpec((1, Cin, TM), lambda n, m: (n, 0, m + 1)),    # halo (next tile)
                pl.BlockSpec((KH * KW, Cout, Cin), lambda n, m: (0, 0, 0)),  # weights resident
                pl.BlockSpec((Cout, 1), lambda n, m: (0, 0)),              # bias resident
            ],
            out_specs=pl.BlockSpec((1, Cout, TM), lambda n, m: (n, 0, m)),
        ),
        compiler_params=pltpu.CompilerParams(
            dimension_semantics=("parallel", "parallel"),
            vmem_limit_bytes=(3 * vmem_cap) // 4,
        ),
        cost_estimate=cost,
    )(x_flat, x_flat, w_r, b_r)

    # Channel-major already; drop the (KW-1) invalid columns of each output row.
    return out_full.reshape(N, Cout, OH, W)[:, :, :, :OW]


def _reference(x, weight, bias, *, stride=1, padding=0, negative_slope=0.2):
    y = lax.conv_general_dilated(
        x, weight,
        window_strides=(stride, stride),
        padding=[(padding, padding), (padding, padding)],
        dimension_numbers=("NCHW", "OIHW", "NCHW"))
    y = y + bias.reshape(1, -1, 1, 1)
    return jnp.where(y >= 0.0, y, negative_slope * y)


if __name__ == "__main__":
    # ConvBlock(in_channels=4, out_channels=8, kernel_size=4, stride=1,
    #           padding=0, nonlin=True, norm=False, spec_norm=False)
    in_channels, out_channels, kernel_size = 4, 8, 4
    N, H, W = 2, 16, 16

    key = jax.random.PRNGKey(0)
    kx, kw, kb = jax.random.split(key, 3)

    x = jax.random.normal(kx, (N, in_channels, H, W), dtype=jnp.float32)
    # Deterministic PyTorch-like (uniform) init for conv weight/bias.
    fan_in = in_channels * kernel_size * kernel_size
    bound = 1.0 / (fan_in ** 0.5)
    weight = jax.random.uniform(
        kw, (out_channels, in_channels, kernel_size, kernel_size),
        minval=-bound, maxval=bound, dtype=jnp.float32)
    bias = jax.random.uniform(
        kb, (out_channels,), minval=-bound, maxval=bound, dtype=jnp.float32)

    fwd = jax.jit(functools.partial(conv_block_forward, stride=1, padding=0,
                                    negative_slope=0.2))
    out = fwd(x, weight, bias)
    jax.block_until_ready(out)

    ref = _reference(x, weight, bias, stride=1, padding=0, negative_slope=0.2)
    assert out.shape == (N, out_channels, H - kernel_size + 1, W - kernel_size + 1)
    assert jnp.allclose(out, ref, atol=2e-2, rtol=2e-2), (
        float(jnp.max(jnp.abs(out - ref))))

    print("KERNEL_OK")
</pallas_src>

<mosaic_0001>
module attributes {stable_mosaic.version = 11 : i64} {
  func.func @_conv_block_kernel(%arg0: i32, %arg1: i32, %arg2: memref<1x4x256xbf16, #tpu.memory_space<vmem>>, %arg3: memref<1x4x256xbf16, #tpu.memory_space<vmem>>, %arg4: memref<16x8x4xbf16, #tpu.memory_space<vmem>>, %arg5: memref<8x1xf32, #tpu.memory_space<vmem>>, %arg6: memref<1x8x256xf32, #tpu.memory_space<vmem>>) attributes {dimension_semantics = [#tpu.dimension_semantics<parallel>, #tpu.dimension_semantics<parallel>], iteration_bounds = array<i64: 2, 1>, scalar_prefetch = 0 : i64, scratch_operands = 0 : i64, tpu.core_type = #tpu.core_type<tc>, window_params = [{transform_indices = @transform_0, window_bounds = array<i64: 1, 4, 256>}, {transform_indices = @transform_1, window_bounds = array<i64: 1, 4, 256>}, {pipeline_mode = #tpu.pipeline_mode<synchronous>, transform_indices = @transform_2, window_bounds = array<i64: 16, 8, 4>}, {pipeline_mode = #tpu.pipeline_mode<synchronous>, transform_indices = @transform_3, window_bounds = array<i64: 8, 1>}, {transform_indices = @transform_4, window_bounds = array<i64: 1, 8, 256>}]} {
    %c0 = arith.constant 0 : index
    %c0_0 = arith.constant 0 : index
    %c0_1 = arith.constant 0 : index
    %0 = vector.load %arg2[%c0, %c0_0, %c0_1] : memref<1x4x256xbf16, #tpu.memory_space<vmem>>, vector<1x4x256xbf16>
    %1 = vector.shape_cast %0 : vector<1x4x256xbf16> to vector<4x256xbf16>
    %c0_2 = arith.constant 0 : index
    %c0_3 = arith.constant 0 : index
    %c0_4 = arith.constant 0 : index
    %2 = vector.load %arg3[%c0_2, %c0_3, %c0_4] : memref<1x4x256xbf16, #tpu.memory_space<vmem>>, vector<1x4x51xbf16>
    %3 = vector.shape_cast %2 : vector<1x4x51xbf16> to vector<4x51xbf16>
    %4 = tpu.concatenate %1, %3 in 1 : vector<4x256xbf16>, vector<4x51xbf16> -> vector<4x307xbf16>
    %cst = arith.constant 0.000000e+00 : f32
    %5 = vector.broadcast %cst : f32 to vector<8x256xf32>
    %6 = vector.extract_strided_slice %4 {offsets = [0, 0], sizes = [4, 256], strides = [1, 1]} : vector<4x307xbf16> to vector<4x256xbf16>
    %c0_5 = arith.constant 0 : index
    %c0_6 = arith.constant 0 : index
    %c0_7 = arith.constant 0 : index
    %7 = vector.load %arg4[%c0_5, %c0_6, %c0_7] : memref<16x8x4xbf16, #tpu.memory_space<vmem>>, vector<1x8x4xbf16>
    %8 = vector.shape_cast %7 : vector<1x8x4xbf16> to vector<8x4xbf16>
    %cst_8 = arith.constant dense<0.000000e+00> : vector<8x256xf32>
    %9 = tpu.matmul %8, %6, %cst_8 {dimension_numbers = #tpu.dot_dimension_numbers<[1], [0], [0], [1], [0, 0, 1, 1], [], []>} : vector<8x4xbf16>, vector<4x256xbf16>, vector<8x256xf32> -> vector<8x256xf32>
    %10 = arith.addf %5, %9 : vector<8x256xf32>
    %11 = vector.extract_strided_slice %4 {offsets = [0, 1], sizes = [4, 256], strides = [1, 1]} : vector<4x307xbf16> to vector<4x256xbf16>
    %c1 = arith.constant 1 : index
    %c0_9 = arith.constant 0 : index
    %c0_10 = arith.constant 0 : index
    %12 = vector.load %arg4[%c1, %c0_9, %c0_10] : memref<16x8x4xbf16, #tpu.memory_space<vmem>>, vector<1x8x4xbf16>
    %13 = vector.shape_cast %12 : vector<1x8x4xbf16> to vector<8x4xbf16>
    %cst_11 = arith.constant dense<0.000000e+00> : vector<8x256xf32>
    %14 = tpu.matmul %13, %11, %cst_11 {dimension_numbers = #tpu.dot_dimension_numbers<[1], [0], [0], [1], [0, 0, 1, 1], [], []>} : vector<8x4xbf16>, vector<4x256xbf16>, vector<8x256xf32> -> vector<8x256xf32>
    %15 = arith.addf %10, %14 : vector<8x256xf32>
    %16 = vector.extract_strided_slice %4 {offsets = [0, 2], sizes = [4, 256], strides = [1, 1]} : vector<4x307xbf16> to vector<4x256xbf16>
    %c2 = arith.constant 2 : index
    %c0_12 = arith.constant 0 : index
    %c0_13 = arith.constant 0 : index
    %17 = vector.load %arg4[%c2, %c0_12, %c0_13] : memref<16x8x4xbf16, #tpu.memory_space<vmem>>, vector<1x8x4xbf16>
    %18 = vector.shape_cast %17 : vector<1x8x4xbf16> to vector<8x4xbf16>
    %cst_14 = arith.constant dense<0.000000e+00> : vector<8x256xf32>
    %19 = tpu.matmul %18, %16, %cst_14 {dimension_numbers = #tpu.dot_dimension_numbers<[1], [0], [0], [1], [0, 0, 1, 1], [], []>} : vector<8x4xbf16>, vector<4x256xbf16>, vector<8x256xf32> -> vector<8x256xf32>
    %20 = arith.addf %15, %19 : vector<8x256xf32>
    %21 = vector.extract_strided_slice %4 {offsets = [0, 3], sizes = [4, 256], strides = [1, 1]} : vector<4x307xbf16> to vector<4x256xbf16>
    %c3 = arith.constant 3 : index
    %c0_15 = arith.constant 0 : index
    %c0_16 = arith.constant 0 : index
    %22 = vector.load %arg4[%c3, %c0_15, %c0_16] : memref<16x8x4xbf16, #tpu.memory_space<vmem>>, vector<1x8x4xbf16>
    %23 = vector.shape_cast %22 : vector<1x8x4xbf16> to vector<8x4xbf16>
    %cst_17 = arith.constant dense<0.000000e+00> : vector<8x256xf32>
    %24 = tpu.matmul %23, %21, %cst_17 {dimension_numbers = #tpu.dot_dimension_numbers<[1], [0], [0], [1], [0, 0, 1, 1], [], []>} : vector<8x4xbf16>, vector<4x256xbf16>, vector<8x256xf32> -> vector<8x256xf32>
    %25 = arith.addf %20, %24 : vector<8x256xf32>
    %26 = vector.extract_strided_slice %4 {offsets = [0, 16], sizes = [4, 256], strides = [1, 1]} : vector<4x307xbf16> to vector<4x256xbf16>
    %c4 = arith.constant 4 : index
    %c0_18 = arith.constant 0 : index
    %c0_19 = arith.constant 0 : index
    %27 = vector.load %arg4[%c4, %c0_18, %c0_19] : memref<16x8x4xbf16, #tpu.memory_space<vmem>>, vector<1x8x4xbf16>
    %28 = vector.shape_cast %27 : vector<1x8x4xbf16> to vector<8x4xbf16>
    %cst_20 = arith.constant dense<0.000000e+00> : vector<8x256xf32>
    %29 = tpu.matmul %28, %26, %cst_20 {dimension_numbers = #tpu.dot_dimension_numbers<[1], [0], [0], [1], [0, 0, 1, 1], [], []>} : vector<8x4xbf16>, vector<4x256xbf16>, vector<8x256xf32> -> vector<8x256xf32>
    %30 = arith.addf %25, %29 : vector<8x256xf32>
    %31 = vector.extract_strided_slice %4 {offsets = [0, 17], sizes = [4, 256], strides = [1, 1]} : vector<4x307xbf16> to vector<4x256xbf16>
    %c5 = arith.constant 5 : index
    %c0_21 = arith.constant 0 : index
    %c0_22 = arith.constant 0 : index
    %32 = vector.load %arg4[%c5, %c0_21, %c0_22] : memref<16x8x4xbf16, #tpu.memory_space<vmem>>, vector<1x8x4xbf16>
    %33 = vector.shape_cast %32 : vector<1x8x4xbf16> to vector<8x4xbf16>
    %cst_23 = arith.constant dense<0.000000e+00> : vector<8x256xf32>
    %34 = tpu.matmul %33, %31, %cst_23 {dimension_numbers = #tpu.dot_dimension_numbers<[1], [0], [0], [1], [0, 0, 1, 1], [], []>} : vector<8x4xbf16>, vector<4x256xbf16>, vector<8x256xf32> -> vector<8x256xf32>
    %35 = arith.addf %30, %34 : vector<8x256xf32>
    %36 = vector.extract_strided_slice %4 {offsets = [0, 18], sizes = [4, 256], strides = [1, 1]} : vector<4x307xbf16> to vector<4x256xbf16>
    %c6 = arith.constant 6 : index
    %c0_24 = arith.constant 0 : index
    %c0_25 = arith.constant 0 : index
    %37 = vector.load %arg4[%c6, %c0_24, %c0_25] : memref<16x8x4xbf16, #tpu.memory_space<vmem>>, vector<1x8x4xbf16>
    %38 = vector.shape_cast %37 : vector<1x8x4xbf16> to vector<8x4xbf16>
    %cst_26 = arith.constant dense<0.000000e+00> : vector<8x256xf32>
    %39 = tpu.matmul %38, %36, %cst_26 {dimension_numbers = #tpu.dot_dimension_numbers<[1], [0], [0], [1], [0, 0, 1, 1], [], []>} : vector<8x4xbf16>, vector<4x256xbf16>, vector<8x256xf32> -> vector<8x256xf32>
    %40 = arith.addf %35, %39 : vector<8x256xf32>
    %41 = vector.extract_strided_slice %4 {offsets = [0, 19], sizes = [4, 256], strides = [1, 1]} : vector<4x307xbf16> to vector<4x256xbf16>
    %c7 = arith.constant 7 : index
    %c0_27 = arith.constant 0 : index
    %c0_28 = arith.constant 0 : index
    %42 = vector.load %arg4[%c7, %c0_27, %c0_28] : memref<16x8x4xbf16, #tpu.memory_space<vmem>>, vector<1x8x4xbf16>
    %43 = vector.shape_cast %42 : vector<1x8x4xbf16> to vector<8x4xbf16>
    %cst_29 = arith.constant dense<0.000000e+00> : vector<8x256xf32>
    %44 = tpu.matmul %43, %41, %cst_29 {dimension_numbers = #tpu.dot_dimension_numbers<[1], [0], [0], [1], [0, 0, 1, 1], [], []>} : vector<8x4xbf16>, vector<4x256xbf16>, vector<8x256xf32> -> vector<8x256xf32>
    %45 = arith.addf %40, %44 : vector<8x256xf32>
    %46 = vector.extract_strided_slice %4 {offsets = [0, 32], sizes = [4, 256], strides = [1, 1]} : vector<4x307xbf16> to vector<4x256xbf16>
    %c8 = arith.constant 8 : index
    %c0_30 = arith.constant 0 : index
    %c0_31 = arith.constant 0 : index
    %47 = vector.load %arg4[%c8, %c0_30, %c0_31] : memref<16x8x4xbf16, #tpu.memory_space<vmem>>, vector<1x8x4xbf16>
    %48 = vector.shape_cast %47 : vector<1x8x4xbf16> to vector<8x4xbf16>
    %cst_32 = arith.constant dense<0.000000e+00> : vector<8x256xf32>
    %49 = tpu.matmul %48, %46, %cst_32 {dimension_numbers = #tpu.dot_dimension_numbers<[1], [0], [0], [1], [0, 0, 1, 1], [], []>} : vector<8x4xbf16>, vector<4x256xbf16>, vector<8x256xf32> -> vector<8x256xf32>
    %50 = arith.addf %45, %49 : vector<8x256xf32>
    %51 = vector.extract_strided_slice %4 {offsets = [0, 33], sizes = [4, 256], strides = [1, 1]} : vector<4x307xbf16> to vector<4x256xbf16>
    %c9 = arith.constant 9 : index
    %c0_33 = arith.constant 0 : index
    %c0_34 = arith.constant 0 : index
    %52 = vector.load %arg4[%c9, %c0_33, %c0_34] : memref<16x8x4xbf16, #tpu.memory_space<vmem>>, vector<1x8x4xbf16>
    %53 = vector.shape_cast %52 : vector<1x8x4xbf16> to vector<8x4xbf16>
    %cst_35 = arith.constant dense<0.000000e+00> : vector<8x256xf32>
    %54 = tpu.matmul %53, %51, %cst_35 {dimension_numbers = #tpu.dot_dimension_numbers<[1], [0], [0], [1], [0, 0, 1, 1], [], []>} : vector<8x4xbf16>, vector<4x256xbf16>, vector<8x256xf32> -> vector<8x256xf32>
    %55 = arith.addf %50, %54 : vector<8x256xf32>
    %56 = vector.extract_strided_slice %4 {offsets = [0, 34], sizes = [4, 256], strides = [1, 1]} : vector<4x307xbf16> to vector<4x256xbf16>
    %c10 = arith.constant 10 : index
    %c0_36 = arith.constant 0 : index
    %c0_37 = arith.constant 0 : index
    %57 = vector.load %arg4[%c10, %c0_36, %c0_37] : memref<16x8x4xbf16, #tpu.memory_space<vmem>>, vector<1x8x4xbf16>
    %58 = vector.shape_cast %57 : vector<1x8x4xbf16> to vector<8x4xbf16>
    %cst_38 = arith.constant dense<0.000000e+00> : vector<8x256xf32>
    %59 = tpu.matmul %58, %56, %cst_38 {dimension_numbers = #tpu.dot_dimension_numbers<[1], [0], [0], [1], [0, 0, 1, 1], [], []>} : vector<8x4xbf16>, vector<4x256xbf16>, vector<8x256xf32> -> vector<8x256xf32>
    %60 = arith.addf %55, %59 : vector<8x256xf32>
    %61 = vector.extract_strided_slice %4 {offsets = [0, 35], sizes = [4, 256], strides = [1, 1]} : vector<4x307xbf16> to vector<4x256xbf16>
    %c11 = arith.constant 11 : index
    %c0_39 = arith.constant 0 : index
    %c0_40 = arith.constant 0 : index
    %62 = vector.load %arg4[%c11, %c0_39, %c0_40] : memref<16x8x4xbf16, #tpu.memory_space<vmem>>, vector<1x8x4xbf16>
    %63 = vector.shape_cast %62 : vector<1x8x4xbf16> to vector<8x4xbf16>
    %cst_41 = arith.constant dense<0.000000e+00> : vector<8x256xf32>
    %64 = tpu.matmul %63, %61, %cst_41 {dimension_numbers = #tpu.dot_dimension_numbers<[1], [0], [0], [1], [0, 0, 1, 1], [], []>} : vector<8x4xbf16>, vector<4x256xbf16>, vector<8x256xf32> -> vector<8x256xf32>
    %65 = arith.addf %60, %64 : vector<8x256xf32>
    %66 = vector.extract_strided_slice %4 {offsets = [0, 48], sizes = [4, 256], strides = [1, 1]} : vector<4x307xbf16> to vector<4x256xbf16>
    %c12 = arith.constant 12 : index
    %c0_42 = arith.constant 0 : index
    %c0_43 = arith.constant 0 : index
    %67 = vector.load %arg4[%c12, %c0_42, %c0_43] : memref<16x8x4xbf16, #tpu.memory_space<vmem>>, vector<1x8x4xbf16>
    %68 = vector.shape_cast %67 : vector<1x8x4xbf16> to vector<8x4xbf16>
    %cst_44 = arith.constant dense<0.000000e+00> : vector<8x256xf32>
    %69 = tpu.matmul %68, %66, %cst_44 {dimension_numbers = #tpu.dot_dimension_numbers<[1], [0], [0], [1], [0, 0, 1, 1], [], []>} : vector<8x4xbf16>, vector<4x256xbf16>, vector<8x256xf32> -> vector<8x256xf32>
    %70 = arith.addf %65, %69 : vector<8x256xf32>
    %71 = vector.extract_strided_slice %4 {offsets = [0, 49], sizes = [4, 256], strides = [1, 1]} : vector<4x307xbf16> to vector<4x256xbf16>
    %c13 = arith.constant 13 : index
    %c0_45 = arith.constant 0 : index
    %c0_46 = arith.constant 0 : index
    %72 = vector.load %arg4[%c13, %c0_45, %c0_46] : memref<16x8x4xbf16, #tpu.memory_space<vmem>>, vector<1x8x4xbf16>
    %73 = vector.shape_cast %72 : vector<1x8x4xbf16> to vector<8x4xbf16>
    %cst_47 = arith.constant dense<0.000000e+00> : vector<8x256xf32>
    %74 = tpu.matmul %73, %71, %cst_47 {dimension_numbers = #tpu.dot_dimension_numbers<[1], [0], [0], [1], [0, 0, 1, 1], [], []>} : vector<8x4xbf16>, vector<4x256xbf16>, vector<8x256xf32> -> vector<8x256xf32>
    %75 = arith.addf %70, %74 : vector<8x256xf32>
    %76 = vector.extract_strided_slice %4 {offsets = [0, 50], sizes = [4, 256], strides = [1, 1]} : vector<4x307xbf16> to vector<4x256xbf16>
    %c14 = arith.constant 14 : index
    %c0_48 = arith.constant 0 : index
    %c0_49 = arith.constant 0 : index
    %77 = vector.load %arg4[%c14, %c0_48, %c0_49] : memref<16x8x4xbf16, #tpu.memory_space<vmem>>, vector<1x8x4xbf16>
    %78 = vector.shape_cast %77 : vector<1x8x4xbf16> to vector<8x4xbf16>
    %cst_50 = arith.constant dense<0.000000e+00> : vector<8x256xf32>
    %79 = tpu.matmul %78, %76, %cst_50 {dimension_numbers = #tpu.dot_dimension_numbers<[1], [0], [0], [1], [0, 0, 1, 1], [], []>} : vector<8x4xbf16>, vector<4x256xbf16>, vector<8x256xf32> -> vector<8x256xf32>
    %80 = arith.addf %75, %79 : vector<8x256xf32>
    %81 = vector.extract_strided_slice %4 {offsets = [0, 51], sizes = [4, 256], strides = [1, 1]} : vector<4x307xbf16> to vector<4x256xbf16>
    %c15 = arith.constant 15 : index
    %c0_51 = arith.constant 0 : index
    %c0_52 = arith.constant 0 : index
    %82 = vector.load %arg4[%c15, %c0_51, %c0_52] : memref<16x8x4xbf16, #tpu.memory_space<vmem>>, vector<1x8x4xbf16>
    %83 = vector.shape_cast %82 : vector<1x8x4xbf16> to vector<8x4xbf16>
    %cst_53 = arith.constant dense<0.000000e+00> : vector<8x256xf32>
    %84 = tpu.matmul %83, %81, %cst_53 {dimension_numbers = #tpu.dot_dimension_numbers<[1], [0], [0], [1], [0, 0, 1, 1], [], []>} : vector<8x4xbf16>, vector<4x256xbf16>, vector<8x256xf32> -> vector<8x256xf32>
    %85 = arith.addf %80, %84 : vector<8x256xf32>
    %c0_54 = arith.constant 0 : index
    %c0_55 = arith.constant 0 : index
    %86 = vector.load %arg5[%c0_54, %c0_55] : memref<8x1xf32, #tpu.memory_space<vmem>>, vector<8x1xf32>
    %87 = vector.broadcast %86 : vector<8x1xf32> to vector<8x256xf32>
    %88 = arith.addf %85, %87 : vector<8x256xf32>
    %cst_56 = arith.constant 0.000000e+00 : f32
    %89 = vector.broadcast %cst_56 : f32 to vector<8x256xf32>
    %90 = arith.cmpf oge, %88, %89 : vector<8x256xf32>
    %cst_57 = arith.constant 2.000000e-01 : f32
    %91 = vector.broadcast %cst_57 : f32 to vector<8x256xf32>
    %92 = arith.mulf %91, %88 : vector<8x256xf32>
    %93 = arith.select %90, %88, %92 : vector<8x256xi1>, vector<8x256xf32>
    %c0_58 = arith.constant 0 : index
    %c0_59 = arith.constant 0 : index
    %c0_60 = arith.constant 0 : index
    %94 = vector.load %arg6[%c0_58, %c0_59, %c0_60] : memref<1x8x256xf32, #tpu.memory_space<vmem>>, vector<1x8x256xf32>
    %95 = vector.shape_cast %94 : vector<1x8x256xf32> to vector<8x256xf32>
    %96 = vector.shape_cast %93 : vector<8x256xf32> to vector<1x8x256xf32>
    tpu.vector_store %arg6[%c0_58, %c0_59, %c0_60], %96 {strides = array<i32>} : memref<1x8x256xf32, #tpu.memory_space<vmem>>, vector<1x8x256xf32>,
    return
  }
  func.func @transform_0(%arg0: i32, %arg1: i32) -> (i32, i32, i32) {
    %c0_i32 = arith.constant 0 : i32
    %c0_i32_0 = arith.constant 0 : i32
    return %arg0, %c0_i32, %arg1 : i32, i32, i32
  }
  func.func @transform_1(%arg0: i32, %arg1: i32) -> (i32, i32, i32) {
    %c1_i32 = arith.constant 1 : i32
    %0 = arith.addi %arg1, %c1_i32 : i32
    %c0_i32 = arith.constant 0 : i32
    %c0_i32_0 = arith.constant 0 : i32
    return %arg0, %c0_i32, %0 : i32, i32, i32
  }
  func.func @transform_2(%arg0: i32, %arg1: i32) -> (i32, i32, i32) {
    %c0_i32 = arith.constant 0 : i32
    %c0_i32_0 = arith.constant 0 : i32
    %c0_i32_1 = arith.constant 0 : i32
    %c0_i32_2 = arith.constant 0 : i32
    return %c0_i32, %c0_i32_0, %c0_i32_1 : i32, i32, i32
  }
  func.func @transform_3(%arg0: i32, %arg1: i32) -> (i32, i32) {
    %c0_i32 = arith.constant 0 : i32
    %c0_i32_0 = arith.constant 0 : i32
    %c0_i32_1 = arith.constant 0 : i32
    return %c0_i32, %c0_i32_0 : i32, i32
  }
  func.func @transform_4(%arg0: i32, %arg1: i32) -> (i32, i32, i32) {
    %c0_i32 = arith.constant 0 : i32
    %c0_i32_0 = arith.constant 0 : i32
    return %arg0, %c0_i32, %arg1 : i32, i32, i32
  }
}

</mosaic_0001>

<bundles_post_ra>
// kernel: conv_block_forward.1
= control target key start
LH: loop header
LB: loop body
LE: loop exit
PB: predicated region body
PF: predicated region fallthrough
CT: control target
= control target key end

     0   :  { %s1583_s15 = smov 0   ;;  %s1585_s16 = smov 0   ;;  %s1760_s0 = inlined_call_operand.vmem [shape: bf16[2,4,512], index: 0, kind: input, shape index: {}, may-alias: {0,1}]   ;;  %s1761_s1 = inlined_call_operand.vmem [shape: bf16[2,4,512], index: 1, kind: input, shape index: {}, may-alias: {0,1}]   ;;  %s1762_s2 = inlined_call_operand.vmem [shape: bf16[16,8,4], index: 2, kind: input, shape index: {}]   ;;  %s1763_s3 = inlined_call_operand.vmem [shape: f32[8,1], index: 3, kind: input, shape index: {}]   ;;  %s1764_s4 = inlined_call_operand.vmem [shape: f32[2,8,208], index: 4, kind: output, shape index: {}]  }
   0x1   :  { %s1587_s17 = smov 0  }
   0x2 LB: > { %s26_s18 = sadd.s32 1, %s1536_s16  ;;  %p1414_p0 = scmp.ge.s32.totalorder %s1540_s17, 1  ;;  %s1540_s17 = sphi %s1587_s17, %s14_s17   ;;  %s1536_s16 = sphi %s1585_s16, %s1766_s16   ;;  %s1532_s15 = sphi %s1583_s15, %s1765_s15  }
   0x3   : > { %p28_p1 = scmp.ge.s32.totalorder %s26_s18, 2  ;;  %p204_p2 = scmp.lt.s32.totalorder %s1540_s17, 3 }
   0x5   : > { %s1768_s18 = smov (%p28_p1, %s26_s18), 0  ;;  %p205_p3 = pnand %p1414_p0, %p204_p2 }
   0x6   : > { %p249_p4 = scmp.lt.s32.totalorder (!%p205_p3), %s1532_s15, 1  ;;  %v1542_v0 = vmov (!%p205_p3), 0   ;;  %vm309_vm0 = vcmask (!%p205_p3), 1041408   ;;  %s1543_s27 = smov (!%p205_p3), 126   ;;  %v292_v5 = vld [vmem:[%s1762_s2] sm:$0xf] (!%p205_p3) }
   0x7   : > { %208 = sbr.rel (%p205_p3) target bundleno = 447 (0x1bf), region = 36  ;;  %348 = vmatprep.mubr.bf16.mxu0 (!%p205_p3), %v1542_v0  ;;  %398 = vmatprep.mubr.bf16.mxu1 (!%p205_p3), %v1542_v0  ;;  %s1544_s28 = smov (!%p205_p3), 127   ;;  %vm305_vm1 = vcmask (!%p205_p3), 31744   ;;  %v1289_v6 = vld [vmem:[%s1763_s3] sm:$0xff] (!%p205_p3)  ;;  %vm302_vm2 = vcmask (!%p205_p3), 1039360   ;;  %vm415_vm3 = vcmask (!%p205_p3), 1031168  }
   0x8   : > { %1516 = vset.pattern.permute.xlu1 (!%p205_p3), %v1542_v0  ;;  %1517 = vset.pattern.permute.xlu0 (!%p205_p3), %v1542_v0  ;;  %s1545_s5 = smov (!%p205_p3), 125   ;;  %s1546_s6 = smov (!%p205_p3), 112   ;;  %v1422_v14 = vld [vmem:[%s1762_s2 + $0x4] sm:$0xf] (!%p205_p3)  ;;  %vm478_vm4 = vcmask (!%p205_p3), 1022976   ;;  %vm541_vm5 = vcmask (!%p205_p3), 916480  }
   0x9   : > { %s1547_s7 = smov (!%p205_p3), 111   ;;  %s1548_s8 = smov (!%p205_p3), 110   ;;  %v1427_v23 = vld [vmem:[%s1762_s2 + $0x8] sm:$0xf] (!%p205_p3)  ;;  %v1430_v28 = vld [vmem:[%s1762_s2 + $0xc] sm:$0xf] (!%p205_p3) }
   0xa   : > { %s1549_s9 = smov (!%p205_p3), 109   ;;  %s1550_s10 = smov (!%p205_p3), 96   ;;  %v1433_v34 = vld [vmem:[%s1762_s2 + $0x10] sm:$0xf] (!%p205_p3)  ;;  %vm604_vm6 = vcmask (!%p205_p3), 908288   ;;  %vm667_vm7 = vcmask (!%p205_p3), 900096  }
   0xb   : > { %s1551_s11 = smov (!%p205_p3), 95   ;;  %s1552_s12 = smov (!%p205_p3), 94   ;;  %v1436_v42 = vld [vmem:[%s1762_s2 + $0x14] sm:$0xf] (!%p205_p3)  ;;  %v1439_v48 = vld [vmem:[%s1762_s2 + $0x18] sm:$0xf] (!%p205_p3) }
   0xc   : > { %s1553_s13 = smov (!%p205_p3), 93   ;;  %s1554_s14 = smov (!%p205_p3), 80   ;;  %vm730_vm8 = vcmask (!%p205_p3), 891904   ;;  %vm793_vm9 = vcmask (!%p205_p3), 785408   ;;  %v1442_v56 = vld [vmem:[%s1762_s2 + $0x1c] sm:$0xf] (!%p205_p3) }
   0xd   : > { %s1556_s20 = smov (!%p205_p3), 78   ;;  %s1557_s21 = smov (!%p205_p3), 77   ;;  %v1445_v62 = vld [vmem:[%s1762_s2 + $0x20] sm:$0xf] (!%p205_p3)  ;;  %vm856_vm10 = vcmask (!%p205_p3), 777216   ;;  %vm919_vm11 = vcmask (!%p205_p3), 769024  }
   0xe   : > { %s1770_s15 = smov (!%p249_p4, %s1532_s15), 1  ;;  %vm982_vm12 = vcmask 760832   ;;  %vm1045_vm13 = vcmask 654336   ;;  %vm1108_vm14 = vcmask 646144   ;;  %vm1171_vm15 = vcmask 637952  }
   0xf   : > { %s1471_s19 = sshll.u32 %s1770_s15, 3 }
  0x10   : > { %s256_s22 = scalar_lea.vmem %s1760_s0, %s1471_s19  ;;  %s1473_s23 = sadd.s32 4, %s1471_s19 }
  0x11   : > { %v1611_v1 = vld.sshfl [vmem:[%s256_s22] sm:$0x33 pattern:$0x76325410]  ;;  %s267_s26 = scalar_lea.vmem %s1761_s1, %s1473_s23  ;;  %s1555_s19 = smov 79  }
  0x12   : > { %409 = vrot.lane.b32.xlu1 %v1611_v1, %s1543_s27  ;;  %296 = vrot.lane.b32.xlu0 %v1611_v1, %s1544_s28  ;;  %v291_v2 = vcombine.high %v1611_v1, %v1611_v1  ;;  %v361_v3 = vsel %vm309_vm0, %v1611_v1, 0  ;;  %v282_v4 = vld [vmem:[%s267_s26] sm:$0x3] }
  0x14   : > { %1425 = vmatprep.subr.msk.bf16.mxu1 %vm309_vm0, %v291_v2 }
  0x15   : > { %367 = vmatpush1.bf16.msra.mxu1 %v361_v3 }
  0x16   : > { %300 = vrot.lane.b32.xlu1 %v282_v4, %s1544_s28  ;;  %298 = vrot.lane.b32.xlu0 %v291_v2, %s1544_s28 }
  0x18   : > { %1426 = vmatmul.mubr.msk.bf16.vlgmr.msra.gmra.mrb[0].mxu1 %vm305_vm1, %v292_v5 }
  0x19   : > { %522 = vmatprep.mubr.bf16.mxu1 %v1542_v0 }
  0x1a   : > { %413 = vrot.lane.b32.xlu1 %v282_v4, %s1543_s27  ;;  %411 = vrot.lane.b32.xlu0 %v291_v2, %s1543_s27 }
  0x1e   : > { %474 = vrot.lane.b32.xlu1 %v291_v2, %s1545_s5  ;;  %472 = vrot.lane.b32.xlu0 %v1611_v1, %s1545_s5 }
  0x22   : > { %535 = vrot.lane.b32.xlu1 %v1611_v1, %s1546_s6  ;;  %476 = vrot.lane.b32.xlu0 %v282_v4, %s1545_s5 }
  0x26   : > { %539 = vrot.lane.b32.xlu1 %v282_v4, %s1546_s6  ;;  %537 = vrot.lane.b32.xlu0 %v291_v2, %s1546_s6  ;;  %s1474_s6 = sshll.u32 %s1770_s15, 4 }
  0x2a   : > { %600 = vrot.lane.b32.xlu1 %v291_v2, %s1547_s7  ;;  %598 = vrot.lane.b32.xlu0 %v1611_v1, %s1547_s7 }
  0x2e   : > { %661 = vrot.lane.b32.xlu1 %v1611_v1, %s1548_s8  ;;  %602 = vrot.lane.b32.xlu0 %v282_v4, %s1547_s7 }
  0x32   : > { %665 = vrot.lane.b32.xlu1 %v282_v4, %s1548_s8  ;;  %663 = vrot.lane.b32.xlu0 %v291_v2, %s1548_s8 }
  0x36   : > { %726 = vrot.lane.b32.xlu1 %v291_v2, %s1549_s9  ;;  %724 = vrot.lane.b32.xlu0 %v1611_v1, %s1549_s9 }
  0x3a   : > { %787 = vrot.lane.b32.xlu1 %v1611_v1, %s1550_s10  ;;  %728 = vrot.lane.b32.xlu0 %v282_v4, %s1549_s9  ;;  %s278_s9 = scalar_lea.vmem %s1764_s4, %s1474_s6 }
  0x3e   : > { %791 = vrot.lane.b32.xlu1 %v282_v4, %s1550_s10  ;;  %789 = vrot.lane.b32.xlu0 %v291_v2, %s1550_s10 }
  0x42   : > { %852 = vrot.lane.b32.xlu1 %v291_v2, %s1551_s11  ;;  %850 = vrot.lane.b32.xlu0 %v1611_v1, %s1551_s11 }
  0x46   : > { %913 = vrot.lane.b32.xlu1 %v1611_v1, %s1552_s12  ;;  %854 = vrot.lane.b32.xlu0 %v282_v4, %s1551_s11 }
  0x4a   : > { %917 = vrot.lane.b32.xlu1 %v282_v4, %s1552_s12  ;;  %915 = vrot.lane.b32.xlu0 %v291_v2, %s1552_s12 }
  0x4e   : > { %978 = vrot.lane.b32.xlu1 %v291_v2, %s1553_s13  ;;  %976 = vrot.lane.b32.xlu0 %v1611_v1, %s1553_s13 }
  0x52   : > { %1039 = vrot.lane.b32.xlu1 %v1611_v1, %s1554_s14  ;;  %980 = vrot.lane.b32.xlu0 %v282_v4, %s1553_s13 }
  0x56   : > { %1043 = vrot.lane.b32.xlu1 %v282_v4, %s1554_s14  ;;  %1041 = vrot.lane.b32.xlu0 %v291_v2, %s1554_s14 }
  0x5a   : > { %1104 = vrot.lane.b32.xlu1 %v291_v2, %s1555_s19  ;;  %1102 = vrot.lane.b32.xlu0 %v1611_v1, %s1555_s19 }
  0x5e   : > { %1165 = vrot.lane.b32.xlu1 %v1611_v1, %s1556_s20  ;;  %1106 = vrot.lane.b32.xlu0 %v282_v4, %s1555_s19 }
  0x62   : > { %1169 = vrot.lane.b32.xlu1 %v282_v4, %s1556_s20  ;;  %1167 = vrot.lane.b32.xlu0 %v291_v2, %s1556_s20 }
  0x66   : > { %1230 = vrot.lane.b32.xlu1 %v291_v2, %s1557_s21  ;;  %1228 = vrot.lane.b32.xlu0 %v1611_v1, %s1557_s21 }
  0x6a   : > { %1232 = vrot.lane.b32.xlu0 %v282_v4, %s1557_s21  ;;  %1292 = vperm.xlu1 %1516, %v1289_v6  }
  0x84   : > { %v410_v7 = vpop.permute.xlu1 %409  ;;  %v297_v8 = vpop.permute.xlu0 %296 }
  0x88   : > { %v301_v9 = vpop.permute.xlu1 %300  ;;  %v299_v10 = vpop.permute.xlu0 %298 }
  0x89   : > { %v304_v11 = vsel %vm302_vm2, %v299_v10, %v301_v9  ;;  %v303_v12 = vsel %vm302_vm2, %v297_v8, %v299_v10  ;;  %vm1234_vm2 = vcmask 629760  }
  0x8a   : > { %1423 = vmatprep.subr.msk.bf16.mxu0 %vm309_vm0, %v304_v11  ;;  %v311_v13 = vsel %vm309_vm0, %v303_v12, 0 }
  0x8b   : > { %317 = vmatpush1.bf16.msra.mxu0 %v311_v13  ;;  %v1451_v13 = vld [vmem:[%s1762_s2 + $0x28] sm:$0xf] }
  0x8c   : > { %v414_v15 = vpop.permute.xlu1 %413  ;;  %v412_v16 = vpop.permute.xlu0 %411 }
  0x8d   : > { %v416_v17 = vsel %vm415_vm3, %v410_v7, %v412_v16  ;;  %v417_v18 = vsel %vm415_vm3, %v412_v16, %v414_v15  ;;  %v1448_v7 = vld [vmem:[%s1762_s2 + $0x24] sm:$0xf] }
  0x8e   : > { %v422_v19 = vsel %vm309_vm0, %v416_v17, 0  ;;  %1428 = vmatprep.subr.msk.bf16.mxu0 %vm309_vm0, %v417_v18  ;;  %1424 = vmatmul.mubr.msk.bf16.vlgmr.msra.gmra.mrb[0].mxu0 %vm305_vm1, %v1422_v14 }
  0x8f   : > { %428 = vmatpush1.bf16.msra.mxu0 %v422_v19  ;;  %459 = vmatprep.mubr.bf16.mxu0 %v1542_v0 }
  0x90   : > { %v475_v20 = vpop.permute.xlu1 %474  ;;  %v473_v21 = vpop.permute.xlu0 %472 }
  0x91   : > { %v479_v22 = vsel %vm478_vm4, %v473_v21, %v475_v20  ;;  %v1454_v21 = vld [vmem:[%s1762_s2 + $0x2c] sm:$0xf] }
  0x92   : > { %v485_v27 = vsel %vm309_vm0, %v479_v22, 0 }
  0x94   : > { %v536_v24 = vpop.permute.xlu1 %535  ;;  %v477_v25 = vpop.permute.xlu0 %476 }
  0x95   : > { %v480_v26 = vsel %vm478_vm4, %v475_v20, %v477_v25 }
  0x96   : > { %1431 = vmatprep.subr.msk.bf16.mxu1 %vm309_vm0, %v480_v26  ;;  %1429 = vmatmul.mubr.msk.bf16.vlgmr.msra.gmra.mrb[4].mxu0 %vm305_vm1, %v1427_v23 }
  0x97   : > { %491 = vmatpush1.bf16.msra.mxu1 %v485_v27  ;;  %585 = vmatprep.mubr.bf16.mxu0 %v1542_v0  ;;  %v1457_v27 = vld [vmem:[%s1762_s2 + $0x30] sm:$0xf] }
  0x98   : > { %v540_v29 = vpop.permute.xlu1 %539  ;;  %v538_v30 = vpop.permute.xlu0 %537 }
  0x99   : > { %v542_v31 = vsel %vm541_vm5, %v536_v24, %v538_v30  ;;  %v543_v32 = vsel %vm541_vm5, %v538_v30, %v540_v29 }
  0x9a   : > { %v548_v33 = vsel %vm309_vm0, %v542_v31, 0  ;;  %1434 = vmatprep.subr.msk.bf16.mxu0 %vm309_vm0, %v543_v32  ;;  %1432 = vmatmul.mubr.msk.bf16.vlgmr.msra.gmra.mrb[4].mxu1 %vm305_vm1, %v1430_v28 }
  0x9b   : > { %554 = vmatpush1.bf16.msra.mxu0 %v548_v33  ;;  %648 = vmatprep.mubr.bf16.mxu1 %v1542_v0 }
  0x9c   : > { %v601_v35 = vpop.permute.xlu1 %600  ;;  %v599_v36 = vpop.permute.xlu0 %598 }
  0x9d   : > { %v605_v37 = vsel %vm604_vm6, %v599_v36, %v601_v35 }
  0x9e   : > { %1435 = vmatmul.mubr.msk.bf16.vlgmr.msra.gmra.mrb[8].mxu0 %vm305_vm1, %v1433_v34  ;;  %v611_v41 = vsel %vm309_vm0, %v605_v37, 0 }
  0x9f   : > { %711 = vmatprep.mubr.bf16.mxu0 %v1542_v0 }
  0xa0   : > { %v662_v38 = vpop.permute.xlu1 %661  ;;  %v603_v39 = vpop.permute.xlu0 %602 }
  0xa1   : > { %v606_v40 = vsel %vm604_vm6, %v601_v35, %v603_v39  ;;  %v1460_v35 = vld [vmem:[%s1762_s2 + $0x34] sm:$0xf] }
  0xa2   : > { %1437 = vmatprep.subr.msk.bf16.mxu1 %vm309_vm0, %v606_v40 }
  0xa3   : > { %617 = vmatpush1.bf16.msra.mxu1 %v611_v41  ;;  %v1463_v41 = vld [vmem:[%s1762_s2 + $0x38] sm:$0xf] }
  0xa4   : > { %v666_v43 = vpop.permute.xlu1 %665  ;;  %v664_v44 = vpop.permute.xlu0 %663 }
  0xa5   : > { %v668_v45 = vsel %vm667_vm7, %v662_v38, %v664_v44  ;;  %v669_v46 = vsel %vm667_vm7, %v664_v44, %v666_v43 }
  0xa6   : > { %v674_v47 = vsel %vm309_vm0, %v668_v45, 0  ;;  %1440 = vmatprep.subr.msk.bf16.mxu0 %vm309_vm0, %v669_v46  ;;  %1438 = vmatmul.mubr.msk.bf16.vlgmr.msra.gmra.mrb[8].mxu1 %vm305_vm1, %v1436_v42 }
  0xa7   : > { %680 = vmatpush1.bf16.msra.mxu0 %v674_v47  ;;  %774 = vmatprep.mubr.bf16.mxu1 %v1542_v0 }
  0xa8   : > { %v727_v49 = vpop.permute.xlu1 %726  ;;  %v725_v50 = vpop.permute.xlu0 %724 }
  0xa9   : > { %v731_v51 = vsel %vm730_vm8, %v725_v50, %v727_v49 }
  0xaa   : > { %1441 = vmatmul.mubr.msk.bf16.vlgmr.msra.gmra.mrb[12].mxu0 %vm305_vm1, %v1439_v48  ;;  %v737_v55 = vsel %vm309_vm0, %v731_v51, 0  ;;  %v1466_v48 = vld [vmem:[%s1762_s2 + $0x3c] sm:$0xf] }
  0xab   : > { %837 = vmatprep.mubr.bf16.mxu0 %v1542_v0 }
  0xac   : > { %v788_v52 = vpop.permute.xlu1 %787  ;;  %v729_v53 = vpop.permute.xlu0 %728 }
  0xad   : > { %v732_v54 = vsel %vm730_vm8, %v727_v49, %v729_v53 }
  0xae   : > { %1443 = vmatprep.subr.msk.bf16.mxu1 %vm309_vm0, %v732_v54 }
  0xaf   : > { %743 = vmatpush1.bf16.msra.mxu1 %v737_v55 }
  0xb0   : > { %v792_v57 = vpop.permute.xlu1 %791  ;;  %v790_v58 = vpop.permute.xlu0 %789 }
  0xb1   : > { %v794_v59 = vsel %vm793_vm9, %v788_v52, %v790_v58  ;;  %v795_v60 = vsel %vm793_vm9, %v790_v58, %v792_v57 }
  0xb2   : > { %v800_v61 = vsel %vm309_vm0, %v794_v59, 0  ;;  %1446 = vmatprep.subr.msk.bf16.mxu0 %vm309_vm0, %v795_v60  ;;  %1444 = vmatmul.mubr.msk.bf16.vlgmr.msra.gmra.mrb[12].mxu1 %vm305_vm1, %v1442_v56 }
  0xb3   : > { %806 = vmatpush1.bf16.msra.mxu0 %v800_v61  ;;  %900 = vmatprep.mubr.bf16.mxu1 %v1542_v0 }
  0xb4   : > { %v853_v63 = vpop.permute.xlu1 %852  ;;  %v851_v1 = vpop.permute.xlu0 %850 }
  0xb5   : > { %v857_v2 = vsel %vm856_vm10, %v851_v1, %v853_v63 }
  0xb6   : > { %1447 = vmatmul.mubr.msk.bf16.vlgmr.msra.gmra.mrb[16].mxu0 %vm305_vm1, %v1445_v62  ;;  %v863_v6 = vsel %vm309_vm0, %v857_v2, 0 }
  0xb7   : > { %963 = vmatprep.mubr.bf16.mxu0 %v1542_v0 }
  0xb8   : > { %v914_v3 = vpop.permute.xlu1 %913  ;;  %v855_v4 = vpop.permute.xlu0 %854 }
  0xb9   : > { %v858_v5 = vsel %vm856_vm10, %v853_v63, %v855_v4 }
  0xba   : > { %1449 = vmatprep.subr.msk.bf16.mxu1 %vm309_vm0, %v858_v5 }
  0xbb   : > { %869 = vmatpush1.bf16.msra.mxu1 %v863_v6 }
  0xbc   : > { %v918_v8 = vpop.permute.xlu1 %917  ;;  %v916_v9 = vpop.permute.xlu0 %915 }
  0xbd   : > { %v920_v10 = vsel %vm919_vm11, %v914_v3, %v916_v9  ;;  %v921_v11 = vsel %vm919_vm11, %v916_v9, %v918_v8 }
  0xbe   : > { %v926_v12 = vsel %vm309_vm0, %v920_v10, 0  ;;  %1450 = vmatmul.mubr.msk.bf16.vlgmr.msra.gmra.mrb[16].mxu1 %vm305_vm1, %v1448_v7  ;;  %1452 = vmatprep.subr.msk.bf16.mxu0 %vm309_vm0, %v921_v11 }
  0xbf   : > { %932 = vmatpush1.bf16.msra.mxu0 %v926_v12  ;;  %1026 = vmatprep.mubr.bf16.mxu1 %v1542_v0 }
  0xc0   : > { %v979_v14 = vpop.permute.xlu1 %978  ;;  %v977_v15 = vpop.permute.xlu0 %976 }
  0xc1   : > { %v983_v16 = vsel %vm982_vm12, %v977_v15, %v979_v14 }
  0xc2   : > { %1453 = vmatmul.mubr.msk.bf16.vlgmr.msra.gmra.mrb[20].mxu0 %vm305_vm1, %v1451_v13  ;;  %v989_v20 = vsel %vm309_vm0, %v983_v16, 0 }
  0xc3   : > { %1089 = vmatprep.mubr.bf16.mxu0 %v1542_v0 }
  0xc4   : > { %v1040_v17 = vpop.permute.xlu1 %1039  ;;  %v981_v18 = vpop.permute.xlu0 %980 }
  0xc5   : > { %v984_v19 = vsel %vm982_vm12, %v979_v14, %v981_v18 }
  0xc6   : > { %1455 = vmatprep.subr.msk.bf16.mxu1 %vm309_vm0, %v984_v19 }
  0xc7   : > { %995 = vmatpush1.bf16.msra.mxu1 %v989_v20 }
  0xc8   : > { %v1044_v22 = vpop.permute.xlu1 %1043  ;;  %v1042_v23 = vpop.permute.xlu0 %1041 }
  0xc9   : > { %v1046_v24 = vsel %vm1045_vm13, %v1040_v17, %v1042_v23  ;;  %v1047_v25 = vsel %vm1045_vm13, %v1042_v23, %v1044_v22 }
  0xca   : > { %v1052_v26 = vsel %vm309_vm0, %v1046_v24, 0  ;;  %1456 = vmatmul.mubr.msk.bf16.vlgmr.msra.gmra.mrb[20].mxu1 %vm305_vm1, %v1454_v21  ;;  %1458 = vmatprep.subr.msk.bf16.mxu0 %vm309_vm0, %v1047_v25 }
  0xcb   : > { %1058 = vmatpush1.bf16.msra.mxu0 %v1052_v26  ;;  %1152 = vmatprep.mubr.bf16.mxu1 %v1542_v0 }
  0xcc   : > { %v1105_v28 = vpop.permute.xlu1 %1104  ;;  %v1103_v29 = vpop.permute.xlu0 %1102 }
  0xcd   : > { %v1109_v30 = vsel %vm1108_vm14, %v1103_v29, %v1105_v28 }
  0xce   : > { %1459 = vmatmul.mubr.msk.bf16.vlgmr.msra.gmra.mrb[24].mxu0 %vm305_vm1, %v1457_v27  ;;  %v1115_v34 = vsel %vm309_vm0, %v1109_v30, 0 }
  0xcf   : > { %1215 = vmatprep.mubr.bf16.mxu0 %v1542_v0 }
  0xd0   : > { %v1166_v31 = vpop.permute.xlu1 %1165  ;;  %v1107_v32 = vpop.permute.xlu0 %1106 }
  0xd1   : > { %v1110_v33 = vsel %vm1108_vm14, %v1105_v28, %v1107_v32 }
  0xd2   : > { %1461 = vmatprep.subr.msk.bf16.mxu1 %vm309_vm0, %v1110_v33 }
  0xd3   : > { %1121 = vmatpush1.bf16.msra.mxu1 %v1115_v34 }
  0xd4   : > { %v1170_v36 = vpop.permute.xlu1 %1169  ;;  %v1168_v37 = vpop.permute.xlu0 %1167 }
  0xd5   : > { %v1172_v38 = vsel %vm1171_vm15, %v1166_v31, %v1168_v37  ;;  %v1173_v39 = vsel %vm1171_vm15, %v1168_v37, %v1170_v36 }
  0xd6   : > { %v1178_v40 = vsel %vm309_vm0, %v1172_v38, 0  ;;  %1462 = vmatmul.mubr.msk.bf16.vlgmr.msra.gmra.mrb[24].mxu1 %vm305_vm1, %v1460_v35  ;;  %1464 = vmatprep.subr.msk.bf16.mxu0 %vm309_vm0, %v1173_v39 }
  0xd7   : > { %1184 = vmatpush1.bf16.msra.mxu0 %v1178_v40  ;;  %1278 = vmatprep.mubr.bf16.mxu1 %v1542_v0 }
  0xd8   : > { %v1231_v42 = vpop.permute.xlu1 %1230  ;;  %v1229_v43 = vpop.permute.xlu0 %1228 }
  0xd9   : > { %v1235_v44 = vsel %vm1234_vm2, %v1229_v43, %v1231_v42 }
  0xda   : > { %1465 = vmatmul.mubr.msk.bf16.vlgmr.msra.gmra.mrb[28].mxu0 %vm305_vm1, %v1463_v41  ;;  %v1241_v47 = vsel %vm309_vm0, %v1235_v44, 0 }
  0xdc   : > { %v1233_v45 = vpop.permute.xlu0 %1232 }
  0xdd   : > { %v1236_v46 = vsel %vm1234_vm2, %v1231_v42, %v1233_v45 }
  0xde   : > { %1467 = vmatprep.subr.msk.bf16.mxu1 %vm309_vm0, %v1236_v46 }
  0xdf   : > { %1247 = vmatpush1.bf16.msra.mxu1 %v1241_v47 }
  0xe2   : > { %1468 = vmatmul.mubr.msk.bf16.vlgmr.msra.gmra.mrb[28].mxu1 %vm305_vm1, %v1466_v48 }
  0xeb   : > { %v400_v0 = vpop.f32.mrb[0].mxu1 }
  0xec   : > { %v402_v49 = vpop.f32.mrb[1].mxu1 }
  0xed   : > { %v404_v50 = vpop.f32.mrb[2].mxu1 }
  0xee   : > { %v405_v51 = vpop.f32.mrb[3].mxu1 }
 0x161   : > { %v350_v52 = vpop.f32.mrb[0].mxu0 }
 0x162   : > { %v352_v53 = vpop.f32.mrb[1].mxu0  ;;  %v401_v54 = vadd.f32 %v400_v0, %v350_v52 }
 0x163   : > { %v354_v55 = vpop.f32.mrb[2].mxu0  ;;  %v403_v56 = vadd.f32 %v402_v49, %v352_v53 }
 0x164   : > { %v355_v57 = vpop.f32.mrb[3].mxu0 }
 0x169   : > { %v461_v58 = vpop.f32.mrb[4].mxu0 }
 0x16a   : > { %v468_v59 = vadd.f32 %v461_v58, %v401_v54  ;;  %v463_v60 = vpop.f32.mrb[5].mxu0 }
 0x16b   : > { %v469_v61 = vadd.f32 %v463_v60, %v403_v56  ;;  %v465_v62 = vpop.f32.mrb[6].mxu0 }
 0x16c   : > { %v466_v63 = vpop.f32.mrb[7].mxu0 }
 0x16d   : > { %v524_v1 = vpop.f32.mrb[4].mxu1 }
 0x16e   : > { %v531_v2 = vadd.f32 %v524_v1, %v468_v59  ;;  %v526_v3 = vpop.f32.mrb[5].mxu1 }
 0x16f   : > { %v532_v4 = vadd.f32 %v526_v3, %v469_v61  ;;  %v528_v5 = vpop.f32.mrb[6].mxu1 }
 0x170   : > { %v529_v6 = vpop.f32.mrb[7].mxu1 }
 0x171   : > { %v587_v7 = vpop.f32.mrb[8].mxu0 }
 0x172   : > { %v594_v8 = vadd.f32 %v587_v7, %v531_v2  ;;  %v589_v9 = vpop.f32.mrb[9].mxu0 }
 0x173   : > { %v595_v10 = vadd.f32 %v589_v9, %v532_v4  ;;  %v591_v11 = vpop.f32.mrb[10].mxu0 }
 0x174   : > { %v592_v12 = vpop.f32.mrb[11].mxu0 }
 0x179   : > { %v650_v13 = vpop.f32.mrb[8].mxu1 }
 0x17a   : > { %v657_v14 = vadd.f32 %v650_v13, %v594_v8  ;;  %v652_v15 = vpop.f32.mrb[9].mxu1 }
 0x17b   : > { %v658_v16 = vadd.f32 %v652_v15, %v595_v10  ;;  %v654_v17 = vpop.f32.mrb[10].mxu1  ;;  %v1293_v10 = vpop.permute.xlu1 %1292 }
 0x17c   : > { %v655_v18 = vpop.f32.mrb[11].mxu1 }
 0x17d   : > { %v713_v19 = vpop.f32.mrb[12].mxu0 }
 0x17e   : > { %v720_v20 = vadd.f32 %v713_v19, %v657_v14  ;;  %v715_v21 = vpop.f32.mrb[13].mxu0 }
 0x17f   : > { %v721_v22 = vadd.f32 %v715_v21, %v658_v16  ;;  %v717_v23 = vpop.f32.mrb[14].mxu0 }
 0x180   : > { %v718_v24 = vpop.f32.mrb[15].mxu0 }
 0x185   : > { %v776_v25 = vpop.f32.mrb[12].mxu1 }
 0x186   : > { %v783_v26 = vadd.f32 %v776_v25, %v720_v20  ;;  %v778_v27 = vpop.f32.mrb[13].mxu1 }
 0x187   : > { %v784_v28 = vadd.f32 %v778_v27, %v721_v22  ;;  %v780_v29 = vpop.f32.mrb[14].mxu1 }
 0x188   : > { %v781_v30 = vpop.f32.mrb[15].mxu1 }
 0x189   : > { %v839_v31 = vpop.f32.mrb[16].mxu0 }
 0x18a   : > { %v846_v32 = vadd.f32 %v839_v31, %v783_v26  ;;  %v841_v33 = vpop.f32.mrb[17].mxu0 }
 0x18b   : > { %v847_v34 = vadd.f32 %v841_v33, %v784_v28  ;;  %v843_v35 = vpop.f32.mrb[18].mxu0 }
 0x18c   : > { %v844_v36 = vpop.f32.mrb[19].mxu0 }
 0x191   : > { %v902_v37 = vpop.f32.mrb[16].mxu1 }
 0x192   : > { %v909_v38 = vadd.f32 %v902_v37, %v846_v32  ;;  %v904_v39 = vpop.f32.mrb[17].mxu1 }
 0x193   : > { %v910_v40 = vadd.f32 %v904_v39, %v847_v34  ;;  %v906_v41 = vpop.f32.mrb[18].mxu1 }
 0x194   : > { %v907_v42 = vpop.f32.mrb[19].mxu1 }
 0x195   : > { %v965_v43 = vpop.f32.mrb[20].mxu0 }
 0x196   : > { %v972_v44 = vadd.f32 %v965_v43, %v909_v38  ;;  %v967_v45 = vpop.f32.mrb[21].mxu0 }
 0x197   : > { %v973_v46 = vadd.f32 %v967_v45, %v910_v40  ;;  %v969_v47 = vpop.f32.mrb[22].mxu0 }
 0x198   : > { %v970_v48 = vpop.f32.mrb[23].mxu0 }
 0x19d   : > { %v1028_v0 = vpop.f32.mrb[20].mxu1 }
 0x19e   : > { %v1035_v49 = vadd.f32 %v1028_v0, %v972_v44  ;;  %v1030_v50 = vpop.f32.mrb[21].mxu1 }
 0x19f   : > { %v1036_v51 = vadd.f32 %v1030_v50, %v973_v46  ;;  %v1032_v52 = vpop.f32.mrb[22].mxu1 }
 0x1a0   : > { %v1033_v53 = vpop.f32.mrb[23].mxu1 }
 0x1a1   : > { %v1091_v54 = vpop.f32.mrb[24].mxu0 }
 0x1a2   : > { %v1098_v55 = vadd.f32 %v1091_v54, %v1035_v49  ;;  %v1093_v56 = vpop.f32.mrb[25].mxu0 }
 0x1a3   : > { %v1099_v57 = vadd.f32 %v1093_v56, %v1036_v51  ;;  %v1095_v58 = vpop.f32.mrb[26].mxu0 }
 0x1a4   : > { %v1096_v59 = vpop.f32.mrb[27].mxu0 }
 0x1a9   : > { %v1154_v60 = vpop.f32.mrb[24].mxu1 }
 0x1aa   : > { %v1161_v61 = vadd.f32 %v1154_v60, %v1098_v55  ;;  %v1156_v62 = vpop.f32.mrb[25].mxu1 }
 0x1ab   : > { %v1162_v63 = vadd.f32 %v1156_v62, %v1099_v57  ;;  %v1158_v1 = vpop.f32.mrb[26].mxu1 }
 0x1ac   : > { %v1159_v2 = vpop.f32.mrb[27].mxu1 }
 0x1ad   : > { %v1217_v3 = vpop.f32.mrb[28].mxu0 }
 0x1ae   : > { %v1224_v4 = vadd.f32 %v1217_v3, %v1161_v61  ;;  %v1219_v5 = vpop.f32.mrb[29].mxu0 }
 0x1af   : > { %v1225_v6 = vadd.f32 %v1219_v5, %v1162_v63  ;;  %v1221_v7 = vpop.f32.mrb[30].mxu0 }
 0x1b0   : > { %v1222_v8 = vpop.f32.mrb[31].mxu0 }
 0x1b5   : > { %v1280_v9 = vpop.f32.mrb[28].mxu1 }
 0x1b6   : > { %v1287_v11 = vadd.f32 %v1280_v9, %v1224_v4  ;;  %v1282_v12 = vpop.f32.mrb[29].mxu1 }
 0x1b7   : > { %v1288_v13 = vadd.f32 %v1282_v12, %v1225_v6  ;;  %v1284_v14 = vpop.f32.mrb[30].mxu1 }
 0x1b8   : > { %v1295_v15 = vadd.f32 %v1293_v10, %v1287_v11  ;;  %v1285_v16 = vpop.f32.mrb[31].mxu1 }
 0x1b9   : > { %v1296_v17 = vadd.f32 %v1293_v10, %v1288_v13 }
 0x1ba   : > { %vm1297_vm0 = vcmp.ge.f32.partialorder %v1295_v15, 0.0  ;;  %v1299_v18 = vmul.f32 0.2, %v1295_v15 }
 0x1bb   : > { %vm1298_vm1 = vcmp.ge.f32.partialorder %v1296_v17, 0.0  ;;  %v1300_v19 = vmul.f32 0.2, %v1296_v17 }
 0x1bc   : > { %v1301_v20 = vsel %vm1297_vm0, %v1295_v15, %v1299_v18 }
 0x1bd   : > { %v1302_v21 = vsel %vm1298_vm1, %v1296_v17, %v1300_v19  ;;  %1303 = vst [vmem:[%s278_s9] sm:$0xff] %v1301_v20 }
 0x1be   : > { %1304 = vst [vmem:[%s278_s9 + $0x8] sm:$0xff] %v1302_v21 }
 0x1bf PF: > { %s14_s17 = sadd.s32 1, %s1540_s17   ;;  %s1765_s15 = smov %s1536_s16 }
 0x1c0   : > { %p11_p5 = scmp.ge.s32.totalorder %s14_s17, 4   ;;  %s1766_s16 = smov %s1768_s18 }
 0x1c2   :  { %13 = sbr.rel (!%p11_p5) target bundleno = 2 (0x2), region = 84 }

</bundles_post_ra>
